<compile_context>
chip_gen: v5e
topology: v5e:2x2
jax: 0.10.0
libtpu: 0.0.40
codegen_flags: <defaults>
</compile_context>

<pallas_src>
import jax
import jax.numpy as jnp
from jax.experimental import pallas as pl
from jax.experimental.pallas import tpu as pltpu

_INV_SQRT2 = 0.7071067811865476
_LN_EPS = 1e-5


def _layer_norm_f32(v, g, b):
    mu = jnp.mean(v, axis=-1, keepdims=True)
    var = jnp.mean(jnp.square(v - mu), axis=-1, keepdims=True)
    return (v - mu) * jax.lax.rsqrt(var + _LN_EPS) * g + b


# --------------------------------------------------------------------------
# Stage 1: LayerNorm + per-head Q/K/V projection.
# --------------------------------------------------------------------------
def _ln_qkv_kernel(x_ref, g1_ref, b1_ref, wq_ref, wk_ref, wv_ref,
                   q_ref, k_ref, v_ref):
    # x_ref: (ts, D) f32; w*_ref: (D, Dh) bf16 for THIS head (Wq pre-scaled by
    # 1/sqrt(Dh)); outputs: (ts, Dh) bf16.
    # LayerNorm is recomputed per head: O(D) VPU work per row, negligible next
    # to the MXU matmuls and it overlaps with them.
    xn = _layer_norm_f32(x_ref[...], g1_ref[...], b1_ref[...]).astype(jnp.bfloat16)
    q_ref[...] = jnp.dot(xn, wq_ref[...],
                         preferred_element_type=jnp.float32).astype(jnp.bfloat16)
    k_ref[...] = jnp.dot(xn, wk_ref[...],
                         preferred_element_type=jnp.float32).astype(jnp.bfloat16)
    v_ref[...] = jnp.dot(xn, wv_ref[...],
                         preferred_element_type=jnp.float32).astype(jnp.bfloat16)


# --------------------------------------------------------------------------
# Stage 2: flash attention (online softmax over kv tiles).
# --------------------------------------------------------------------------
def _flash_attn_kernel(q_ref, k_ref, v_ref, o_ref, m_sc, l_sc, acc_sc):
    ki = pl.program_id(3)

    @pl.when(ki == 0)
    def _():
        m_sc[...] = jnp.full(m_sc.shape, -jnp.inf, dtype=m_sc.dtype)
        l_sc[...] = jnp.zeros(l_sc.shape, dtype=l_sc.dtype)
        acc_sc[...] = jnp.zeros(acc_sc.shape, dtype=acc_sc.dtype)

    q = q_ref[...]                     # (tq, Dh) bf16 (softmax scale folded in)
    k = k_ref[...]                     # (tk, Dh) bf16
    v = v_ref[...]                     # (tk, Dh) bf16

    s = jax.lax.dot_general(q, k, (((1,), (1,)), ((), ())),
                            preferred_element_type=jnp.float32)      # (tq, tk)

    m_prev = m_sc[...]
    m_new = jnp.maximum(m_prev, jnp.max(s, axis=-1, keepdims=True))
    alpha = jnp.exp(m_prev - m_new)
    p = jnp.exp(s - m_new)
    l_sc[...] = alpha * l_sc[...] + jnp.sum(p, axis=-1, keepdims=True)
    acc_sc[...] = alpha * acc_sc[...] + jnp.dot(
        p.astype(v.dtype), v, preferred_element_type=jnp.float32)
    m_sc[...] = m_new

    @pl.when(ki == pl.num_programs(3) - 1)
    def _():
        # Deferred softmax normalization: one O(tq*Dh) scale instead of an
        # O(tq*tk) multiply per kv step.  approx reciprocal (~1e-3 rel err)
        # runs on the EUP slot.
        inv_l = pl.reciprocal(l_sc[...], approx=True)
        o_ref[...] = (acc_sc[...] * inv_l).astype(o_ref.dtype)


# --------------------------------------------------------------------------
# Stage 3: fused output projection + residual + LayerNorm3 + GEGLU FF.
# --------------------------------------------------------------------------
def _proj_ff_kernel(attn_ref, x_ref, wo_ref, bo_ref, g3_ref, b3_ref,
                    wff1a_ref, wff1g_ref, bff1a_ref, bff1g_ref,
                    wff2_ref, bff2_ref, o_ref):
    # Single fused output projection: contraction over the full inner = H*Dh.
    x1 = x_ref[...] + bo_ref[...] + jnp.dot(
        attn_ref[...], wo_ref[...], preferred_element_type=jnp.float32)

    xn3 = _layer_norm_f32(x1, g3_ref[...], b3_ref[...]).astype(jnp.bfloat16)
    a = jnp.dot(xn3, wff1a_ref[...],
                preferred_element_type=jnp.float32) + bff1a_ref[...]
    gate = jnp.dot(xn3, wff1g_ref[...],
                   preferred_element_type=jnp.float32) + bff1g_ref[...]
    # Exact erf-GELU to match PyTorch F.gelu numerics (tanh approx would move
    # the polynomial onto the EUP but changes results).
    gelu_gate = 0.5 * gate * (1.0 + jax.lax.erf(gate * _INV_SQRT2))
    hidden = (a * gelu_gate).astype(jnp.bfloat16)
    ff = jnp.dot(hidden, wff2_ref[...],
                 preferred_element_type=jnp.float32) + bff2_ref[...]
    o_ref[...] = x1 + ff


# --------------------------------------------------------------------------
# Wrapper.
# --------------------------------------------------------------------------
def _vmem_limit_bytes():
    # Re-derive per generation: ~48 MiB on v7x (64 MiB/TC), ~96 MiB on v5e/v6e.
    cap = 128 * 1024 * 1024
    try:
        info = pltpu.get_tpu_info()
        cap = int(getattr(info, "vmem_capacity_bytes", cap) or cap)
    except Exception:
        pass
    return int(min(100 * 1024 * 1024, (cap * 3) // 4))


def _seq_tile(n, target):
    if n <= target:
        return n
    assert n % target == 0, f"dim {n} must be divisible by tile {target}"
    return target


def _row_tile(rows, target):
    if rows > target:
        assert rows % target == 0, f"rows {rows} must be divisible by {target}"
        return target
    half = rows // 2
    if rows % 2 == 0 and half >= 8 and half % 8 == 0:
        return half          # >=2 grid steps so v7x's second TensorCore has work
    return rows


def basic_transformer_block(x, params, *, n_heads, d_head,
                            seq_block=256, q_block=256, kv_block=256,
                            row_block=256):
    """LDM BasicTransformerBlock forward (self-attention + GEGLU FF)."""
    B, S, D = x.shape
    (g1, b1, wq, wk, wv, wo, bo, g3, b3, wff1, bff1, wff2, bff2) = params
    H, Dh = n_heads, d_head
    inner = H * Dh
    F = wff2.shape[0]
    assert wq.shape == (D, inner) and wo.shape == (inner, D)
    assert wff1.shape == (D, 2 * F)

    vmem_limit = _vmem_limit_bytes()

    # ---- host-side (one-time) weight prep ---------------------------------
    scale = 1.0 / (float(Dh) ** 0.5)

    def split_heads(w, s=1.0):
        # (D, H*Dh) -> (H, D, Dh): each head's columns become a full-dim block
        # selected by the BlockSpec index_map (no lane-misaligned slicing).
        return (w * s).reshape(D, H, Dh).transpose(1, 0, 2).astype(jnp.bfloat16)

    wq_h = split_heads(wq, scale)            # softmax scale folded into Wq
    wk_h = split_heads(wk)
    wv_h = split_heads(wv)
    wo_b = wo.astype(jnp.bfloat16)
    wff1_a = wff1[:, :F].astype(jnp.bfloat16)   # GEGLU value half
    wff1_g = wff1[:, F:].astype(jnp.bfloat16)   # GEGLU gate half
    bff1_a = bff1[:, :F]
    bff1_g = bff1[:, F:]
    wff2_b = wff2.astype(jnp.bfloat16)

    # ---- stage 1: LayerNorm + per-head QKV --------------------------------
    ts = _seq_tile(S, seq_block)
    ns = S // ts
    qkv_sds = jax.ShapeDtypeStruct((B, H, S, Dh), jnp.bfloat16)
    q, k, v = pl.pallas_call(
        _ln_qkv_kernel,
        out_shape=(qkv_sds, qkv_sds, qkv_sds),
        grid=(B, ns, H),
        in_specs=[
            pl.BlockSpec((None, ts, D), lambda b, s, h: (b, s, 0)),
            pl.BlockSpec((1, D), lambda b, s, h: (0, 0)),
            pl.BlockSpec((1, D), lambda b, s, h: (0, 0)),
            pl.BlockSpec((None, D, Dh), lambda b, s, h: (h, 0, 0)),
            pl.BlockSpec((None, D, Dh), lambda b, s, h: (h, 0, 0)),
            pl.BlockSpec((None, D, Dh), lambda b, s, h: (h, 0, 0)),
        ],
        out_specs=(
            pl.BlockSpec((None, None, ts, Dh), lambda b, s, h: (b, h, s, 0)),
            pl.BlockSpec((None, None, ts, Dh), lambda b, s, h: (b, h, s, 0)),
            pl.BlockSpec((None, None, ts, Dh), lambda b, s, h: (b, h, s, 0)),
        ),
        compiler_params=pltpu.CompilerParams(
            dimension_semantics=("parallel", "parallel", "parallel"),
            vmem_limit_bytes=vmem_limit),
    )(x, g1, b1, wq_h, wk_h, wv_h)

    # ---- stage 2: flash attention ------------------------------------------
    tq = _seq_tile(S, q_block)
    tk = _seq_tile(S, kv_block)
    nq, nk = S // tq, S // tk
    attn = pl.pallas_call(
        _flash_attn_kernel,
        out_shape=jax.ShapeDtypeStruct((B, H, S, Dh), jnp.bfloat16),
        grid=(B, H, nq, nk),
        in_specs=[
            pl.BlockSpec((None, None, tq, Dh), lambda b, h, qi, ki: (b, h, qi, 0)),
            pl.BlockSpec((None, None, tk, Dh), lambda b, h, qi, ki: (b, h, ki, 0)),
            pl.BlockSpec((None, None, tk, Dh), lambda b, h, qi, ki: (b, h, ki, 0)),
        ],
        out_specs=pl.BlockSpec((None, None, tq, Dh),
                               lambda b, h, qi, ki: (b, h, qi, 0)),
        scratch_shapes=[
            pltpu.VMEM((tq, 1), jnp.float32),    # running max m
            pltpu.VMEM((tq, 1), jnp.float32),    # running denom l
            pltpu.VMEM((tq, Dh), jnp.float32),   # running (unnormalized) output
        ],
        compiler_params=pltpu.CompilerParams(
            dimension_semantics=("parallel", "parallel", "parallel", "arbitrary"),
            vmem_limit_bytes=vmem_limit),
    )(q, k, v)

    # ---- stage 3: out-projection + residual + LayerNorm3 + GEGLU FF --------
    # Head concat done by XLA as a cheap HBM layout change so the output
    # projection is one K=inner matmul instead of n_heads K=Dh matmuls.
    rows = B * S
    attn_cat = jnp.transpose(attn, (0, 2, 1, 3)).reshape(rows, inner)
    x2d = x.reshape(rows, D)

    tr = _row_tile(rows, row_block)
    nr = rows // tr
    out2d = pl.pallas_call(
        _proj_ff_kernel,
        out_shape=jax.ShapeDtypeStruct((rows, D), jnp.float32),
        grid=(nr,),
        in_specs=[
            pl.BlockSpec((tr, inner), lambda r: (r, 0)),    # attn (concat heads)
            pl.BlockSpec((tr, D), lambda r: (r, 0)),        # x (residual)
            pl.BlockSpec((inner, D), lambda r: (0, 0)),     # wo
            pl.BlockSpec((1, D), lambda r: (0, 0)),         # bo
            pl.BlockSpec((1, D), lambda r: (0, 0)),         # g3
            pl.BlockSpec((1, D), lambda r: (0, 0)),         # b3
            pl.BlockSpec((D, F), lambda r: (0, 0)),         # wff1 value half
            pl.BlockSpec((D, F), lambda r: (0, 0)),         # wff1 gate half
            pl.BlockSpec((1, F), lambda r: (0, 0)),         # bff1 value half
            pl.BlockSpec((1, F), lambda r: (0, 0)),         # bff1 gate half
            pl.BlockSpec((F, D), lambda r: (0, 0)),         # wff2
            pl.BlockSpec((1, D), lambda r: (0, 0)),         # bff2
        ],
        out_specs=pl.BlockSpec((tr, D), lambda r: (r, 0)),
        compiler_params=pltpu.CompilerParams(
            dimension_semantics=("parallel",),
            vmem_limit_bytes=vmem_limit),
    )(attn_cat, x2d, wo_b, bo, g3, b3,
      wff1_a, wff1_g, bff1_a, bff1_g, wff2_b, bff2)

    return out2d.reshape(B, S, D)


# --------------------------------------------------------------------------
# Pure-JAX reference & parameter construction (self-check).
# --------------------------------------------------------------------------
def _reference(x, params, *, n_heads, d_head):
    (g1, b1, wq, wk, wv, wo, bo, g3, b3, wff1, bff1, wff2, bff2) = params

    def ln(v, g, b):
        mu = jnp.mean(v, axis=-1, keepdims=True)
        var = jnp.mean((v - mu) ** 2, axis=-1, keepdims=True)
        return (v - mu) * jax.lax.rsqrt(var + _LN_EPS) * g + b

    B, S, D = x.shape
    xn = ln(x, g1, b1)
    q = (xn @ wq).reshape(B, S, n_heads, d_head).transpose(0, 2, 1, 3)
    k = (xn @ wk).reshape(B, S, n_heads, d_head).transpose(0, 2, 1, 3)
    v = (xn @ wv).reshape(B, S, n_heads, d_head).transpose(0, 2, 1, 3)
    s = jnp.einsum("bhid,bhjd->bhij", q, k) / (d_head ** 0.5)
    p = jax.nn.softmax(s, axis=-1)
    o = jnp.einsum("bhij,bhjd->bhid", p, v)
    o = o.transpose(0, 2, 1, 3).reshape(B, S, -1)
    x1 = x + (o @ wo + bo)

    xn3 = ln(x1, g3, b3)
    proj = xn3 @ wff1 + bff1
    a, gate = jnp.split(proj, 2, axis=-1)
    hidden = a * jax.nn.gelu(gate, approximate=False)
    return x1 + (hidden @ wff2 + bff2)


def _make_params(key, dim, n_heads, d_head, ff_mult=4):
    inner = n_heads * d_head
    ff_inner = dim * ff_mult
    ks = jax.random.split(key, 8)
    std = 0.02
    g1 = jnp.ones((1, dim), jnp.float32)
    b1 = jnp.zeros((1, dim), jnp.float32)
    wq = (std * jax.random.normal(ks[0], (dim, inner))).astype(jnp.float32)
    wk = (std * jax.random.normal(ks[1], (dim, inner))).astype(jnp.float32)
    wv = (std * jax.random.normal(ks[2], (dim, inner))).astype(jnp.float32)
    wo = (std * jax.random.normal(ks[3], (inner, dim))).astype(jnp.float32)
    bo = (std * jax.random.normal(ks[4], (1, dim))).astype(jnp.float32)
    g3 = jnp.ones((1, dim), jnp.float32)
    b3 = jnp.zeros((1, dim), jnp.float32)
    wff1 = (std * jax.random.normal(ks[5], (dim, 2 * ff_inner))).astype(jnp.float32)
    bff1 = (std * jax.random.normal(ks[6], (1, 2 * ff_inner))).astype(jnp.float32)
    wff2 = (std * jax.random.normal(ks[7], (ff_inner, dim))).astype(jnp.float32)
    bff2 = jnp.zeros((1, dim), jnp.float32)
    return (g1, b1, wq, wk, wv, wo, bo, g3, b3, wff1, bff1, wff2, bff2)


if __name__ == "__main__":
    B, S = 2, 8
    dim, n_heads, d_head = 32, 4, 8          # inner = 32, ff_inner = 128

    key = jax.random.PRNGKey(0)
    k_x, k_p = jax.random.split(key)
    x = jax.random.normal(k_x, (B, S, dim), dtype=jnp.float32)
    params = _make_params(k_p, dim, n_heads, d_head)

    out = basic_transformer_block(x, params, n_heads=n_heads, d_head=d_head)
    out = jax.block_until_ready(out)

    ref = _reference(x, params, n_heads=n_heads, d_head=d_head)
    assert out.shape == (B, S, dim)
    # bf16 MXU operands + approx-reciprocal softmax denom => bf16-level tol
    # against the exact f32 reference.
    assert jnp.allclose(out, ref, atol=1e-2, rtol=1e-2), "mismatch vs JAX reference"

    print("KERNEL_OK")
</pallas_src>

<mosaic_0001>
module attributes {stable_mosaic.version = 11 : i64} {
  func.func @_ln_qkv_kernel(%arg0: i32, %arg1: i32, %arg2: i32, %arg3: memref<1x8x32xf32, #tpu.memory_space<vmem>>, %arg4: memref<1x32xf32, #tpu.memory_space<vmem>>, %arg5: memref<1x32xf32, #tpu.memory_space<vmem>>, %arg6: memref<1x32x8xbf16, #tpu.memory_space<vmem>>, %arg7: memref<1x32x8xbf16, #tpu.memory_space<vmem>>, %arg8: memref<1x32x8xbf16, #tpu.memory_space<vmem>>, %arg9: memref<1x1x8x8xbf16, #tpu.memory_space<vmem>>, %arg10: memref<1x1x8x8xbf16, #tpu.memory_space<vmem>>, %arg11: memref<1x1x8x8xbf16, #tpu.memory_space<vmem>>) attributes {dimension_semantics = [#tpu.dimension_semantics<parallel>, #tpu.dimension_semantics<parallel>, #tpu.dimension_semantics<parallel>], iteration_bounds = array<i64: 2, 1, 4>, scalar_prefetch = 0 : i64, scratch_operands = 0 : i64, tpu.core_type = #tpu.core_type<tc>, window_params = [{transform_indices = @transform_0, window_bounds = array<i64: 1, 8, 32>}, {pipeline_mode = #tpu.pipeline_mode<synchronous>, transform_indices = @transform_1, window_bounds = array<i64: 1, 32>}, {pipeline_mode = #tpu.pipeline_mode<synchronous>, transform_indices = @transform_2, window_bounds = array<i64: 1, 32>}, {transform_indices = @transform_3, window_bounds = array<i64: 1, 32, 8>}, {transform_indices = @transform_4, window_bounds = array<i64: 1, 32, 8>}, {transform_indices = @transform_5, window_bounds = array<i64: 1, 32, 8>}, {transform_indices = @transform_6, window_bounds = array<i64: 1, 1, 8, 8>}, {transform_indices = @transform_7, window_bounds = array<i64: 1, 1, 8, 8>}, {transform_indices = @transform_8, window_bounds = array<i64: 1, 1, 8, 8>}]} {
    %c0 = arith.constant 0 : index
    %c0_0 = arith.constant 0 : index
    %c0_1 = arith.constant 0 : index
    %0 = vector.load %arg3[%c0, %c0_0, %c0_1] : memref<1x8x32xf32, #tpu.memory_space<vmem>>, vector<1x8x32xf32>
    %1 = vector.shape_cast %0 : vector<1x8x32xf32> to vector<8x32xf32>
    %c0_2 = arith.constant 0 : index
    %c0_3 = arith.constant 0 : index
    %2 = vector.load %arg4[%c0_2, %c0_3] : memref<1x32xf32, #tpu.memory_space<vmem>>, vector<1x32xf32>
    %c0_4 = arith.constant 0 : index
    %c0_5 = arith.constant 0 : index
    %3 = vector.load %arg5[%c0_4, %c0_5] : memref<1x32xf32, #tpu.memory_space<vmem>>, vector<1x32xf32>
    %cst = arith.constant dense<0.000000e+00> : vector<8xf32>
    %4 = vector.multi_reduction <add>, %1, %cst [1] : vector<8x32xf32> to vector<8xf32>
    %5 = vector.shape_cast %4 : vector<8xf32> to vector<8x1xf32>
    %cst_6 = arith.constant 3.200000e+01 : f32
    %6 = vector.broadcast %cst_6 : f32 to vector<8x1xf32>
    %7 = arith.divf %5, %6 : vector<8x1xf32>
    %8 = vector.broadcast %7 : vector<8x1xf32> to vector<8x32xf32>
    %9 = arith.subf %1, %8 : vector<8x32xf32>
    %10 = arith.mulf %9, %9 : vector<8x32xf32>
    %cst_7 = arith.constant dense<0.000000e+00> : vector<8xf32>
    %11 = vector.multi_reduction <add>, %10, %cst_7 [1] : vector<8x32xf32> to vector<8xf32>
    %12 = vector.shape_cast %11 : vector<8xf32> to vector<8x1xf32>
    %cst_8 = arith.constant 3.200000e+01 : f32
    %13 = vector.broadcast %cst_8 : f32 to vector<8x1xf32>
    %14 = arith.divf %12, %13 : vector<8x1xf32>
    %15 = vector.broadcast %7 : vector<8x1xf32> to vector<8x32xf32>
    %16 = arith.subf %1, %15 : vector<8x32xf32>
    %cst_9 = arith.constant 9.99999974E-6 : f32
    %17 = vector.broadcast %cst_9 : f32 to vector<8x1xf32>
    %18 = arith.addf %14, %17 : vector<8x1xf32>
    %19 = math.rsqrt %18 : vector<8x1xf32>
    %20 = vector.broadcast %19 : vector<8x1xf32> to vector<8x32xf32>
    %21 = arith.mulf %16, %20 : vector<8x32xf32>
    %22 = vector.broadcast %2 : vector<1x32xf32> to vector<8x32xf32>
    %23 = arith.mulf %21, %22 : vector<8x32xf32>
    %24 = vector.broadcast %3 : vector<1x32xf32> to vector<8x32xf32>
    %25 = arith.addf %23, %24 : vector<8x32xf32>
    %26 = arith.truncf %25 : vector<8x32xf32> to vector<8x32xbf16>
    %c0_10 = arith.constant 0 : index
    %c0_11 = arith.constant 0 : index
    %c0_12 = arith.constant 0 : index
    %27 = vector.load %arg6[%c0_10, %c0_11, %c0_12] : memref<1x32x8xbf16, #tpu.memory_space<vmem>>, vector<1x32x8xbf16>
    %28 = vector.shape_cast %27 : vector<1x32x8xbf16> to vector<32x8xbf16>
    %cst_13 = arith.constant dense<0.000000e+00> : vector<8x8xf32>
    %29 = tpu.matmul %26, %28, %cst_13 {dimension_numbers = #tpu.dot_dimension_numbers<[1], [0], [0], [1], [0, 0, 1, 1], [], []>} : vector<8x32xbf16>, vector<32x8xbf16>, vector<8x8xf32> -> vector<8x8xf32>
    %30 = arith.truncf %29 : vector<8x8xf32> to vector<8x8xbf16>
    %c0_14 = arith.constant 0 : index
    %c0_15 = arith.constant 0 : index
    %c0_16 = arith.constant 0 : index
    %c0_17 = arith.constant 0 : index
    %31 = vector.load %arg9[%c0_14, %c0_15, %c0_16, %c0_17] : memref<1x1x8x8xbf16, #tpu.memory_space<vmem>>, vector<1x1x8x8xbf16>
    %32 = vector.shape_cast %31 : vector<1x1x8x8xbf16> to vector<8x8xbf16>
    %33 = vector.shape_cast %30 : vector<8x8xbf16> to vector<1x1x8x8xbf16>
    tpu.vector_store %arg9[%c0_14, %c0_15, %c0_16, %c0_17], %33 {strides = array<i32>} : memref<1x1x8x8xbf16, #tpu.memory_space<vmem>>, vector<1x1x8x8xbf16>,
    %c0_18 = arith.constant 0 : index
    %c0_19 = arith.constant 0 : index
    %c0_20 = arith.constant 0 : index
    %34 = vector.load %arg7[%c0_18, %c0_19, %c0_20] : memref<1x32x8xbf16, #tpu.memory_space<vmem>>, vector<1x32x8xbf16>
    %35 = vector.shape_cast %34 : vector<1x32x8xbf16> to vector<32x8xbf16>
    %cst_21 = arith.constant dense<0.000000e+00> : vector<8x8xf32>
    %36 = tpu.matmul %26, %35, %cst_21 {dimension_numbers = #tpu.dot_dimension_numbers<[1], [0], [0], [1], [0, 0, 1, 1], [], []>} : vector<8x32xbf16>, vector<32x8xbf16>, vector<8x8xf32> -> vector<8x8xf32>
    %37 = arith.truncf %36 : vector<8x8xf32> to vector<8x8xbf16>
    %c0_22 = arith.constant 0 : index
    %c0_23 = arith.constant 0 : index
    %c0_24 = arith.constant 0 : index
    %c0_25 = arith.constant 0 : index
    %38 = vector.load %arg10[%c0_22, %c0_23, %c0_24, %c0_25] : memref<1x1x8x8xbf16, #tpu.memory_space<vmem>>, vector<1x1x8x8xbf16>
    %39 = vector.shape_cast %38 : vector<1x1x8x8xbf16> to vector<8x8xbf16>
    %40 = vector.shape_cast %37 : vector<8x8xbf16> to vector<1x1x8x8xbf16>
    tpu.vector_store %arg10[%c0_22, %c0_23, %c0_24, %c0_25], %40 {strides = array<i32>} : memref<1x1x8x8xbf16, #tpu.memory_space<vmem>>, vector<1x1x8x8xbf16>,
    %c0_26 = arith.constant 0 : index
    %c0_27 = arith.constant 0 : index
    %c0_28 = arith.constant 0 : index
    %41 = vector.load %arg8[%c0_26, %c0_27, %c0_28] : memref<1x32x8xbf16, #tpu.memory_space<vmem>>, vector<1x32x8xbf16>
    %42 = vector.shape_cast %41 : vector<1x32x8xbf16> to vector<32x8xbf16>
    %cst_29 = arith.constant dense<0.000000e+00> : vector<8x8xf32>
    %43 = tpu.matmul %26, %42, %cst_29 {dimension_numbers = #tpu.dot_dimension_numbers<[1], [0], [0], [1], [0, 0, 1, 1], [], []>} : vector<8x32xbf16>, vector<32x8xbf16>, vector<8x8xf32> -> vector<8x8xf32>
    %44 = arith.truncf %43 : vector<8x8xf32> to vector<8x8xbf16>
    %c0_30 = arith.constant 0 : index
    %c0_31 = arith.constant 0 : index
    %c0_32 = arith.constant 0 : index
    %c0_33 = arith.constant 0 : index
    %45 = vector.load %arg11[%c0_30, %c0_31, %c0_32, %c0_33] : memref<1x1x8x8xbf16, #tpu.memory_space<vmem>>, vector<1x1x8x8xbf16>
    %46 = vector.shape_cast %45 : vector<1x1x8x8xbf16> to vector<8x8xbf16>
    %47 = vector.shape_cast %44 : vector<8x8xbf16> to vector<1x1x8x8xbf16>
    tpu.vector_store %arg11[%c0_30, %c0_31, %c0_32, %c0_33], %47 {strides = array<i32>} : memref<1x1x8x8xbf16, #tpu.memory_space<vmem>>, vector<1x1x8x8xbf16>,
    return
  }
  func.func @transform_0(%arg0: i32, %arg1: i32, %arg2: i32) -> (i32, i32, i32) {
    %c0_i32 = arith.constant 0 : i32
    %c0_i32_0 = arith.constant 0 : i32
    return %arg0, %arg1, %c0_i32 : i32, i32, i32
  }
  func.func @transform_1(%arg0: i32, %arg1: i32, %arg2: i32) -> (i32, i32) {
    %c0_i32 = arith.constant 0 : i32
    %c0_i32_0 = arith.constant 0 : i32
    %c0_i32_1 = arith.constant 0 : i32
    return %c0_i32, %c0_i32_0 : i32, i32
  }
  func.func @transform_2(%arg0: i32, %arg1: i32, %arg2: i32) -> (i32, i32) {
    %c0_i32 = arith.constant 0 : i32
    %c0_i32_0 = arith.constant 0 : i32
    %c0_i32_1 = arith.constant 0 : i32
    return %c0_i32, %c0_i32_0 : i32, i32
  }
  func.func @transform_3(%arg0: i32, %arg1: i32, %arg2: i32) -> (i32, i32, i32) {
    %c0_i32 = arith.constant 0 : i32
    %c0_i32_0 = arith.constant 0 : i32
    %c0_i32_1 = arith.constant 0 : i32
    return %arg2, %c0_i32, %c0_i32_0 : i32, i32, i32
  }
  func.func @transform_4(%arg0: i32, %arg1: i32, %arg2: i32) -> (i32, i32, i32) {
    %c0_i32 = arith.constant 0 : i32
    %c0_i32_0 = arith.constant 0 : i32
    %c0_i32_1 = arith.constant 0 : i32
    return %arg2, %c0_i32, %c0_i32_0 : i32, i32, i32
  }
  func.func @transform_5(%arg0: i32, %arg1: i32, %arg2: i32) -> (i32, i32, i32) {
    %c0_i32 = arith.constant 0 : i32
    %c0_i32_0 = arith.constant 0 : i32
    %c0_i32_1 = arith.constant 0 : i32
    return %arg2, %c0_i32, %c0_i32_0 : i32, i32, i32
  }
  func.func @transform_6(%arg0: i32, %arg1: i32, %arg2: i32) -> (i32, i32, i32, i32) {
    %c0_i32 = arith.constant 0 : i32
    %c0_i32_0 = arith.constant 0 : i32
    return %arg0, %arg2, %arg1, %c0_i32 : i32, i32, i32, i32
  }
  func.func @transform_7(%arg0: i32, %arg1: i32, %arg2: i32) -> (i32, i32, i32, i32) {
    %c0_i32 = arith.constant 0 : i32
    %c0_i32_0 = arith.constant 0 : i32
    return %arg0, %arg2, %arg1, %c0_i32 : i32, i32, i32, i32
  }
  func.func @transform_8(%arg0: i32, %arg1: i32, %arg2: i32) -> (i32, i32, i32, i32) {
    %c0_i32 = arith.constant 0 : i32
    %c0_i32_0 = arith.constant 0 : i32
    return %arg0, %arg2, %arg1, %c0_i32 : i32, i32, i32, i32
  }
}

</mosaic_0001>

<bundles_post_ra>
// kernel: tpu_custom_call.1
= control target key start
LH: loop header
LB: loop body
LE: loop exit
PB: predicated region body
PF: predicated region fallthrough
CT: control target
= control target key end

     0   :  { %s1387_s0 = inlined_call_operand.vmem [shape: f32[2,8,32], index: 0, kind: input, shape index: {}]   ;;  %s1388_s1 = inlined_call_operand.vmem [shape: f32[1,32], index: 1, kind: input, shape index: {}]   ;;  %s1389_s2 = inlined_call_operand.vmem [shape: f32[1,32], index: 2, kind: input, shape index: {}]   ;;  %s1390_s3 = inlined_call_operand.vmem [shape: bf16[4,32,8], index: 3, kind: input, shape index: {}]   ;;  %s1391_s4 = inlined_call_operand.vmem [shape: bf16[4,32,8], index: 4, kind: input, shape index: {}]   ;;  %s1392_s5 = inlined_call_operand.vmem [shape: bf16[4,32,8], index: 5, kind: input, shape index: {}]   ;;  %s1393_s6 = inlined_call_operand.hbm [shape: bf16[2,4,8,8], index: 6, kind: output, shape index: {0}]   ;;  %s1394_s7 = inlined_call_operand.hbm [shape: bf16[2,4,8,8], index: 7, kind: output, shape index: {1}]   ;;  %s1395_s8 = inlined_call_operand.hbm [shape: bf16[2,4,8,8], index: 8, kind: output, shape index: {2}]  }
   0x1   :  { %1403 = sst [smem:[#allocation11_spill]] %s1387_s0 }
   0x2   :  { %1404 = sst [smem:[#allocation12_spill]] %s1388_s1 }
   0x3   :  { %1405 = sst [smem:[#allocation13_spill]] %s1389_s2 }
   0x4   :  { %1406 = sst [smem:[#allocation14_spill]] %s1390_s3 }
   0x5   :  { %1407 = sst [smem:[#allocation15_spill]] %s1391_s4 }
   0x6   :  { %1408 = sst [smem:[#allocation16_spill]] %s1392_s5 }
   0x7   :  { %14 = vsyncpa [#allocation3], 0 }
   0x8   :  { %16 = vsyncpa [#allocation3 + $0x1], 0 }
   0x9   :  { %17 = vsyncpa [#allocation5], 0 }
   0xa   :  { %19 = vsyncpa [#allocation5 + $0x1], 0  ;;  %s1160_s27 = smov 0   ;;  %s1162_s28 = smov 0  }
   0xb   :  { %s1164_s29 = smov 0   ;;  %s1166_s30 = smov 0  }
   0xc   :  { %s1168_s9 = smov 0   ;;  %s1170_s10 = smov 0  }
   0xd   :  { %s1172_s11 = smov 0   ;;  %s1174_s12 = smov 0  }
   0xe LB: > { %s1397_s13 = sadd.s32 4294967295, %s1112_s12   ;;  %s1396_s14 = sadd.s32 4294967294, %s1112_s12   ;;  %s1112_s12 = sphi %s1174_s12, %s25_s12   ;;  %s1108_s11 = sphi %s1172_s11, %s1433_s11   ;;  %s1104_s10 = sphi %s1170_s10, %s1432_s10   ;;  %s1100_s9 = sphi %s1168_s9, %s1431_s9   ;;  %s1096_s30 = sphi %s1166_s30, %s1430_s30   ;;  %s1092_s29 = sphi %s1164_s29, %s1429_s29   ;;  %s1088_s28 = sphi %s1162_s28, %s1428_s28   ;;  %s1084_s27 = sphi %s1160_s27, %s1427_s27  }
   0xf   : > { %s37_s15 = sadd.s32 1, %s1104_s10  ;;  %s44_s16 = sadd.s32 1, %s1108_s11 }
  0x10   : > { %p38_p0 = scmp.ge.s32.totalorder %s37_s15, 4  ;;  %p213_p1 = scmp.ne.s32.totalorder %s1092_s29, %s1088_s28 }
  0x11   : > { %p214_p2 = scmp.eq.s32.totalorder %s1397_s13, 7  ;;  %p219_p5 = scmp.ne.s32.totalorder %s1088_s28, %s1084_s27 }
  0x12   : > { %s1435_s15 = smov (%p38_p0, %s37_s15), 0  ;;  %s1437_s16 = smov (!%p38_p0, %s44_s16), %s1108_s11 }
  0x13   : > { %s197_s17 = ssub.s32 %s1104_s10, %s1435_s15  ;;  %p1213_p3 = por %p214_p2, %p213_p1 }
  0x14   : > { %p46_p4 = scmp.ge.s32.totalorder %s1437_s16, 2  ;;  %p220_p6 = scmp.eq.s32.totalorder %s1396_s14, 7 }
  0x15   : > { %p812_p7 = scmp.ge.s32.totalorder %s1112_s12, 1  ;;  %p338_p9 = scmp.lt.s32.totalorder %s1112_s12, 9 }
  0x16   : > { %s1439_s16 = smov (%p46_p4, %s1437_s16), 0  ;;  %p1224_p8 = por %p220_p6, %p219_p5 }
  0x17   : > { %1410 = sst [smem:[#allocation9_spill]] %s1439_s16  ;;  %s196_s20 = ssub.s32 %s1108_s11, %s1439_s16 }
  0x18   : > { %s203_s21 = sadd.s32 1, %s1092_s29  ;;  %s198_s22 = sor.u32 %s197_s17, %s196_s20 }
  0x19   : > { %p339_p10 = pnand %p812_p7, %p338_p9  ;;  %p201_p11 = scmp.eq.s32.totalorder %s198_s22, 0 }
  0x1b   : > { %s1233_s23 = scalar_select %p201_p11, %s1092_s29, %s203_s21  }
  0x1c   : > { %342 = sbr.rel (%p339_p10) target bundleno = 471 (0x1d7), region = 44 }
  0x21   : > { %p399_p12 = scmp.lt.s32.totalorder %s1100_s9, 1  ;;  %vm425_vm0 = vcmask 261120   ;;  %s1412_s0 = sld [smem:[#allocation11_spill]]  ;;  %v1114_v2 = vmov 32.0   ;;  %vm497_vm5 = vcmask 60416  }
  0x22   : > { %954 = vrcp.f32 %v1114_v2  ;;  %p406_p13 = scmp.lt.s32.totalorder %s1096_s30, 3  ;;  %s1413_s3 = sld [smem:[#allocation14_spill]] }
  0x23   : > { %s400_s24 = scalar_select %p399_p12, %s1100_s9, 1 }
  0x24   : > { %s1414_s4 = sld [smem:[#allocation15_spill]]  ;;  %s853_s17 = sshll.u32 %s1100_s9, 2 }
  0x25   : > { %s816_s25 = sshll.u32 %s400_s24, 3  ;;  %s1415_s5 = sld [smem:[#allocation16_spill]] }
  0x26   : > { %s1416_s1 = sld [smem:[#allocation12_spill]]  ;;  %s583_s20 = sadd.s32 %s1096_s30, %s853_s17 }
  0x27   : > { %s405_s13 = scalar_lea.vmem %s1412_s0, %s816_s25  ;;  %s1417_s2 = sld [smem:[#allocation13_spill]] }
  0x28   : > { %v422_v0 = vld [vmem:[%s405_s13] sm:$0xff]  ;;  %v955_v3 = vpop.eup %954  ;;  %s407_s13 = scalar_select %p406_p13, %s1096_s30, 3 }
  0x29   : > { %v426_v1 = vsel %vm425_vm0, %v422_v0, 0.0  ;;  %v430_v4 = vmul.f32 32.0, %v955_v3  ;;  %vm434_vm1 = vweird.f32 %v955_v3  ;;  %s854_s22 = sshll.u32 %s583_s20, 2 }
  0x2a   : > { %427 = vadd.xlane.f32.xlu0 %v426_v1  ;;  %s861_s14 = sshll.u32 %s407_s13, 4  ;;  %s602_s13 = scalar_lea.hbm %s1394_s7, %s854_s22 }
  0x2b   : > { %v431_v5 = vsub.f32 1.0, %v430_v4  ;;  %s410_s21 = scalar_lea.vmem %s1413_s3, %s861_s14  ;;  %s415_s25 = scalar_lea.vmem %s1414_s4, %s861_s14 }
  0x2c   : > { %s420_s16 = scalar_lea.vmem %s1415_s5, %s861_s14  ;;  %v865_v14 = vld [vmem:[%s410_s21 + $0x8] sm:$0xff]  ;;  %v864_v17 = vld [vmem:[%s410_s21] sm:$0xff]  ;;  %s1399_s21 = sand.u32 1, %s1088_s28  }
  0x2d   : > { %v432_v6 = vmul.f32 %v955_v3, %v431_v5  ;;  %v867_v15 = vld [vmem:[%s415_s25 + $0x8] sm:$0xff]  ;;  %489 = vmatpush.bf16.msra.mxu0 %v865_v14  ;;  %v866_v18 = vld [vmem:[%s415_s25] sm:$0xff]  ;;  %s1267_s24 = sshll.u32 %s1399_s21, 2  ;;  %s1418_s25 = sadd.s32 4294967295, %s1112_s12  }
  0x2e   : > { %v869_v16 = vld [vmem:[%s420_s16 + $0x8] sm:$0xff]  ;;  %521 = vmatpush.bf16.msra.mxu1 %v867_v15  ;;  %v868_v19 = vld [vmem:[%s420_s16] sm:$0xff]  ;;  %s1271_s26 = sand.u32 1, %s1418_s25   ;;  %s585_s9 = scalar_lea.hbm %s1393_s6, %s854_s22 }
  0x2f   : > { %v433_v7 = vadd.f32 %v955_v3, %v432_v6  ;;  %552 = vmatpush.bf16.msra.mxu2 %v869_v16  ;;  %v952_v29 = vld [vmem:[%s1416_s1] ss:$0 sm:$0xff]  ;;  %s391_s30 = scalar_lea.vmem [#allocation4], %s1267_s24  ;;  %s1282_s20 = sshll.u32 %s602_s13, 4  ;;  %s607_s20 = int_to_ptr.hbm [resolvable:$true] %s1282_s20 }
  0x30   : > { %v953_v32 = vld [vmem:[%s1417_s2] ss:$0 sm:$0xff]  ;;  %s1280_s17 = sshll.u32 %s391_s30, 4  ;;  %s1400_s21 = scalar_lea.vmem [#allocation2], %s1267_s24  ;;  %s605_s17 = int_to_ptr.vmem [resolvable:$true] %s1280_s17 }
  0x31   : > { %v435_v8 = vsel %vm434_vm1, %v955_v3, %v433_v7  ;;  %490 = vmatpush.bf16.msra.mxu0 %v864_v17  ;;  %s1287_s25 = sshll.u32 %s1400_s21, 4  ;;  %s1289_s0 = sshll.u32 %s585_s9, 4  ;;  %s590_s0 = int_to_ptr.hbm [resolvable:$true] %s1289_s0 }
  0x32   : > { %522 = vmatpush.bf16.msra.mxu1 %v866_v18  ;;  %1419 = sst [smem:[#allocation10_spill]] %s1287_s25  ;;  %s619_s13 = scalar_lea.hbm %s1395_s8, %s854_s22 }
  0x33   : > { %553 = vmatpush.bf16.msra.mxu2 %v868_v19  ;;  %s1402_s14 = scalar_lea.vmem [#allocation6], %s1267_s24  ;;  %s1304_s21 = sshll.u32 %s619_s13, 4  ;;  %s624_s21 = int_to_ptr.hbm [resolvable:$true] %s1304_s21 }
  0x34   : > { %s1302_s9 = sshll.u32 %s1402_s14, 4  ;;  %s567_s2 = scalar_lea.sflag [#allocation5], %s1271_s26  ;;  %s622_s9 = int_to_ptr.vmem [resolvable:$true] %s1302_s9 }
  0x35   : > { %s972_s3 = sshra.s32 %s607_s20, 4  ;;  %s978_s16 = scalar_lea.hbm %s1394_s7, 32  ;;  %s973_s3 = int_to_ptr.hbm [resolvable:$true] %s972_s3 }
  0x36   : > { %s974_s4 = scalar_lea.hbm %s973_s3, 4  ;;  %p979_p4 = scmp.lt.s32.totalorder %s973_s3, %s1394_s7 }
  0x37   : > { %p975_p0 = scmp.ne.s32.totalorder %s973_s3, %s974_s4  ;;  %p980_p5 = scmp.lt.s32.totalorder %s978_s16, %s974_s4 }
  0x39   : > { %p976_p1 = pnand %p975_p0, %p1213_p3  ;;  %p981_p6 = por %p980_p5, %p979_p4 }
  0x3b   : > { %p977_p2 = pneg %p976_p1 }
  0x3d   : > { %p982_p7 = pnand %p981_p6, %p977_p2 }
  0x9d   : > { %v428_v9 = vpop.xlane.xlu0 %427 }
  0x9e   : > { %v436_v10 = vmul.f32 %v435_v8, %v428_v9 }
  0xa0   : > { %v437_v11 = vsub.f32 %v422_v0, %v436_v10 }
  0xa2   : > { %v438_v12 = vmul.f32 %v437_v11, %v437_v11 }
  0xa4   : > { %v439_v13 = vsel %vm425_vm0, %v438_v12, 0.0 }
  0xa5   : > { %440 = vadd.xlane.f32.xlu0 %v439_v13 }
 0x118   : > { %v441_v20 = vpop.xlane.xlu0 %440 }
 0x119   : > { %v442_v21 = vmul.f32 %v441_v20, %v435_v8 }
 0x11b   : > { %v443_v22 = vadd.f32 1e-05, %v442_v21 }
 0x11d   : > { %956 = vrsqrt.f32 %v443_v22  ;;  %vm450_vm3 = vweird.f32 %v443_v22 }
 0x123   : > { %v957_v23 = vpop.eup %956 }
 0x124   : > { %v445_v24 = vmul.f32 %v957_v23, %v443_v22  ;;  %vm451_vm2 = vweird.f32 %v957_v23 }
 0x125   : > { %vm452_vm4 = vmor %vm450_vm3, %vm451_vm2 }
 0x126   : > { %v446_v25 = vmul.f32 %v957_v23, %v445_v24 }
 0x128   : > { %v447_v26 = vmul.f32 0.5, %v446_v25 }
 0x12a   : > { %v448_v27 = vsub.f32 1.5, %v447_v26 }
 0x12c   : > { %v449_v28 = vmul.f32 %v957_v23, %v448_v27 }
 0x12e   : > { %v453_v30 = vsel %vm452_vm4, %v957_v23, %v449_v28 }
 0x12f   : > { %v454_v31 = vmul.f32 %v453_v30, %v437_v11 }
 0x131   : > { %v458_v33 = vmul.f32 %v952_v29, %v454_v31 }
 0x133   : > { %v462_v34 = vadd.f32 %v953_v32, %v458_v33 }
 0x135   : > { %v463_v35 = vpack.c.bf16 %v462_v34, %v462_v34 }
 0x137   : > { %831 = vmatmul.msk.bf16.vlgmr.msra.gmra.mxu0 %vm425_vm0, %v463_v35  ;;  %840 = vmatmul.msk.bf16.vlgmr.msra.gmra.mxu1 %vm425_vm0, %v463_v35 }
 0x138   : > { %849 = vmatmul.msk.bf16.vlgmr.msra.gmra.mxu2 %vm425_vm0, %v463_v35 }
 0x1b4   : > { %v492_v36 = vpop.f32.mrf.mxu0  ;;  %v524_v37 = vpop.f32.mrf.mxu1 }
 0x1b5   : > { %v496_v38 = vpack.c.bf16 %v492_v36, %v492_v36  ;;  %v528_v39 = vpack.c.bf16 %v524_v37, %v524_v37 }
 0x1b7   : > { %529 = vst.msk [vmem:[%s391_s30] sm:$0xf] %vm497_vm5, %v528_v39 }
 0x1b8   : > { %985 = shalt.err (!%p982_p7)
}
 0x1b9   : > { %871 = dma.vmem_to_hbm [thread:$0]  (%p1213_p3), %s605_s17, 64, %s607_s20, %s567_s2  }
 0x1ba   : > { %s1420_s13 = scalar_lea.vmem [#allocation2], %s1267_s24  ;;  %s1421_s22 = sand.u32 1, %s1088_s28  }
 0x1bb   : > { %498 = vst.msk [vmem:[%s1420_s13] sm:$0xf] %vm497_vm5, %v496_v38  ;;  %s562_s1 = scalar_lea.sflag [#allocation3], %s1421_s22  ;;  %s1000_s3 = sshra.s32 %s590_s0, 4  ;;  %s1001_s3 = int_to_ptr.hbm [resolvable:$true] %s1000_s3 }
 0x1bc   : > { %s1002_s4 = scalar_lea.hbm %s1001_s3, 4  ;;  %s1006_s30 = scalar_lea.hbm %s1393_s6, 32 }
 0x1bd   : > { %p1003_p9 = scmp.ne.s32.totalorder %s1001_s3, %s1002_s4  ;;  %p1007_p12 = scmp.lt.s32.totalorder %s1001_s3, %s1393_s6 }
 0x1be   : > { %p1008_p13 = scmp.lt.s32.totalorder %s1006_s30, %s1002_s4 }
 0x1bf   : > { %p1004_p10 = pnand %p1003_p9, %p1213_p3 }
 0x1c0   : > { %p1009_p0 = por %p1008_p13, %p1007_p12 }
 0x1c1   : > { %p1005_p11 = pneg %p1004_p10 }
 0x1c3   : > { %p1010_p1 = pnand %p1009_p0, %p1005_p11 }
 0x1c5   : > { %1013 = shalt.err (!%p1010_p1)
}
 0x1c6   : > { %s1422_s17 = sld [smem:[#allocation10_spill]]  ;;  %v555_v40 = vpop.f32.mrf.mxu2  ;;  %v494_v42 = vpop.f32.mrf.mxu0  ;;  %s1424_s5 = scalar_lea.vmem [#allocation6], %s1267_s24 }
 0x1c7   : > { %v559_v41 = vpack.c.bf16 %v555_v40, %v555_v40  ;;  %v526_v43 = vpop.f32.mrf.mxu1  ;;  %s1028_s14 = sshra.s32 %s624_s21, 4  ;;  %s1029_s14 = int_to_ptr.hbm [resolvable:$true] %s1028_s14 }
 0x1c8   : > { %s1030_s13 = scalar_lea.hbm %s1029_s14, 4  ;;  %p1035_p6 = scmp.lt.s32.totalorder %s1029_s14, %s1395_s8 }
 0x1c9   : > { %560 = vst.msk [vmem:[%s1424_s5] sm:$0xf] %vm497_vm5, %v559_v41  ;;  %p1031_p2 = scmp.ne.s32.totalorder %s1029_s14, %s1030_s13 }
 0x1cb   : > { %p1032_p4 = pnand %p1031_p2, %p1213_p3 }
 0x1cc   : > { %s1423_s20 = int_to_ptr.vmem [resolvable:$true] %s1422_s17 }
 0x1cd   : > { %870 = dma.vmem_to_hbm [thread:$0]  (%p1213_p3), %s1423_s20, 64, %s590_s0, %s562_s1  }
 0x1ce   : > { %p1033_p5 = pneg %p1032_p4  ;;  %s1034_s0 = scalar_lea.hbm %s1395_s8, 32 }
 0x1cf   : > { %p1036_p7 = scmp.lt.s32.totalorder %s1034_s0, %s1030_s13 }
 0x1d1   : > { %p1037_p9 = por %p1036_p7, %p1035_p6 }
 0x1d3   : > { %p1038_p10 = pnand %p1037_p9, %p1033_p5 }
 0x1d5   : > { %1041 = shalt.err (!%p1038_p10)
}
 0x1d6   : > { %872 = dma.vmem_to_hbm [thread:$0]  (%p1213_p3), %s622_s9, 64, %s624_s21, %s567_s2   ;;  %v557_v44 = vpop.f32.mrf.mxu2 }
 0x1d7 PF: > { %p886_p11 = scmp.ge.s32.totalorder %s1112_s12, 2  ;;  %s635_s24 = sand.u32 1, %s1084_s27  }
 0x1d8   : > { %s636_s25 = scalar_lea.sflag [#allocation3], %s635_s24 }
 0x1d9   : > { %p877_p12 = pnand %p886_p11, %p1224_p8 }
 0x1db   : > { %p878_p13 = pneg %p877_p12 }
 0x1dd   : > { %1075 = dma.done.wait (%p878_p13), %s636_s25, 64  }
 0x1de   : > { %1077 = vsyncadd (%p878_p13), %s636_s25, 4294967232  ;;  %s1425_s16 = sadd.s32 4294967294, %s1112_s12  }
 0x1df   : > { %s645_s30 = sand.u32 1, %s1425_s16  }
 0x1e0   : > { %s646_s18 = scalar_lea.sflag [#allocation5], %s645_s30 }
 0x1e1   : > { %1079 = dma.done.wait (%p878_p13), %s646_s18, 128  }
 0x1e2   : > { %1081 = vsyncadd (%p878_p13), %s646_s18, 4294967168  ;;  %s25_s12 = sadd.s32 1, %s1112_s12   ;;  %s1426_s2 = sld [smem:[#allocation9_spill]] }
 0x1e3   : > { %p22_p3 = scmp.ge.s32.totalorder %s25_s12, 10   ;;  %s1427_s27 = smov %s1088_s28 }
 0x1e4   : > { %s1428_s28 = smov %s1092_s29  ;;  %s1429_s29 = smov %s1233_s23 }
 0x1e5   : > { %s1430_s30 = smov %s1104_s10  ;;  %s1431_s9 = smov %s1108_s11 }
 0x1e6   : > { %s1432_s10 = smov %s1435_s15  ;;  %24 = sbr.rel (!%p22_p3) target bundleno = 14 (0xe), region = 120 }
 0x1e8   : > { %s1433_s11 = smov %s1426_s2 }
 0x1eb   :  { %662 = vsyncpa [#allocation3], 1 }
 0x1ec   :  { %664 = vsyncpa [#allocation3 + $0x1], 1 }
 0x1ed   :  { %665 = vsyncpa [#allocation5], 1 }
 0x1ee   :  { %667 = vsyncpa [#allocation5 + $0x1], 1 }

</bundles_post_ra>
